<compile_context>
chip_gen: v5e
topology: v5e:2x2
jax: 0.10.0
libtpu: 0.0.40
codegen_flags: <defaults>
</compile_context>

<pallas_src>
import math

import jax
import jax.numpy as jnp
from jax.experimental import pallas as pl
from jax.experimental.pallas import tpu as pltpu

_T_SCALE = 5.0                         # Normal(0, 5) voxels
_R_SCALE = 0.1 * math.pi / 180.0       # Normal(0, 0.1) degrees -> radians
_Z_SCALE = math.log(2.0) / 3.0         # LogNormal(0, log(2)/3)
_S_SCALE = 0.01                        # Normal(0, 0.01)

_LANE = 128
_MAX_TILE = 2048                       # lanes per grid step (review: 512-4096)


def _affine_classic_kernel(noise_ref, o_ref):
    """noise_ref: (12, T) iid N(0,1); o_ref: (16, T) row-major 4x4 per lane."""
    # Single full-block load; per-group scaling done in-kernel.
    n = noise_ref[...].astype(jnp.float32)              # (12, T)
    t = n[0:3, :] * _T_SCALE                             # translation (voxels)
    r = n[3:6, :] * _R_SCALE                             # rotation (radians)
    z = jnp.exp(n[6:9, :] * _Z_SCALE)                    # log-normal zoom (EUP)
    s = n[9:12, :] * _S_SCALE                            # shear

    tx, ty, tz = t[0:1, :], t[1:2, :], t[2:3, :]
    rx, ry, rz = r[0:1, :], r[1:2, :], r[2:3, :]
    zx, zy, zz = z[0:1, :], z[1:2, :], z[2:3, :]
    s0, s1, s2 = s[0:1, :], s[1:2, :], s[2:3, :]

    cx, sx = jnp.cos(rx), jnp.sin(rx)
    cy, sy = jnp.cos(ry), jnp.sin(ry)
    cz, sz = jnp.cos(rz), jnp.sin(rz)

    # R = Rx @ Ry @ Rz  (SPM / "classic" convention), closed form.
    r00 = cy * cz
    r01 = cy * sz
    r02 = sy
    r10 = -cx * sz - sx * sy * cz
    r11 = cx * cz - sx * sy * sz
    r12 = sx * cy
    r20 = sx * sz - cx * sy * cz
    r21 = -sx * cz - cx * sy * sz
    r22 = cx * cy

    # RZ = R @ diag(zx, zy, zz)   (scale the columns)
    a00, a10, a20 = r00 * zx, r10 * zx, r20 * zx
    a01, a11, a21 = r01 * zy, r11 * zy, r21 * zy
    a02, a12, a22 = r02 * zz, r12 * zz, r22 * zz

    # M3 = RZ @ S  with  S = [[1, s0, s1], [0, 1, s2], [0, 0, 1]]
    m00, m10, m20 = a00, a10, a20
    m01 = a00 * s0 + a01
    m11 = a10 * s0 + a11
    m21 = a20 * s0 + a21
    m02 = a00 * s1 + a01 * s2 + a02
    m12 = a10 * s1 + a11 * s2 + a12
    m22 = a20 * s1 + a21 * s2 + a22

    zero = jnp.zeros_like(tx)
    one = jnp.ones_like(tx)

    # M = T @ (Rx Ry Rz Z S): translation lands in the last column.
    # Two full 8-sublane slab stores (unmasked vst on lane-dense tiles).
    top = jnp.concatenate([m00, m01, m02, tx, m10, m11, m12, ty], axis=0)
    bot = jnp.concatenate([m20, m21, m22, tz, zero, zero, zero, one], axis=0)
    o_ref[0:8, :] = top.astype(o_ref.dtype)
    o_ref[8:16, :] = bot.astype(o_ref.dtype)


def affine_sample(key, batch=1, dim=3, dtype=jnp.float32, lane_dense=False):
    """JAX/Pallas equivalent of AffineSample().forward(batch) with dim=3.

    If lane_dense=True, returns the (16, batch) lane-dense kernel output
    directly (row-major flattened 4x4 per lane) so downstream consumers can
    fuse/skip the transpose; otherwise returns (batch, 4, 4).
    """
    assert dim == 3, "only dim=3 is implemented"
    nprm = 4 * dim  # 3 translation + 3 rotation + 3 zoom + 3 shear = 12

    # --- single N(0,1) draw; all scaling happens inside the kernel ------------
    noise = jax.random.normal(key, (nprm, batch), jnp.float32)

    # --- lane-axis tiling ------------------------------------------------------
    if batch <= _LANE:
        tile = batch                                   # full-extent block
    else:
        tile = min(_MAX_TILE, pl.cdiv(batch, _LANE) * _LANE)  # multiple of 128
    grid = (pl.cdiv(batch, tile),)

    out = pl.pallas_call(
        _affine_classic_kernel,
        out_shape=jax.ShapeDtypeStruct((16, batch), dtype),
        grid=grid,
        in_specs=[pl.BlockSpec((nprm, tile), lambda i: (0, i))],
        out_specs=pl.BlockSpec((16, tile), lambda i: (0, i)),
        compiler_params=pltpu.CompilerParams(
            dimension_semantics=("parallel",)),
    )(noise)

    if lane_dense:
        return out
    # TODO(synk): this transpose is an extra full HBM pass; large-batch callers
    # should consume the lane-dense (16, batch) layout via lane_dense=True.
    return out.T.reshape(batch, dim + 1, dim + 1)


def _prm_from_noise(noise):
    """Apply the module's per-group scaling to a (12, batch) N(0,1) draw."""
    return jnp.concatenate(
        [
            noise[0:3] * _T_SCALE,
            noise[3:6] * _R_SCALE,
            jnp.exp(noise[6:9] * _Z_SCALE),
            noise[9:12] * _S_SCALE,
        ],
        axis=0,
    )


def _affine_sample_ref(prm, dim=3):
    """Pure-JAX reference: T @ Rx @ Ry @ Rz @ Z @ S via explicit matmuls."""
    batch = prm.shape[1]
    eye = jnp.eye(dim + 1, dtype=prm.dtype)

    def one_mat(p):
        tx, ty, tz, rx, ry, rz, zx, zy, zz, s0, s1, s2 = [p[i] for i in range(12)]
        T = eye.at[0, 3].set(tx).at[1, 3].set(ty).at[2, 3].set(tz)
        cx, sx = jnp.cos(rx), jnp.sin(rx)
        cy, sy = jnp.cos(ry), jnp.sin(ry)
        cz, sz = jnp.cos(rz), jnp.sin(rz)
        Rx = jnp.array([[1, 0, 0, 0], [0, cx, sx, 0], [0, -sx, cx, 0], [0, 0, 0, 1]], prm.dtype)
        Ry = jnp.array([[cy, 0, sy, 0], [0, 1, 0, 0], [-sy, 0, cy, 0], [0, 0, 0, 1]], prm.dtype)
        Rz = jnp.array([[cz, sz, 0, 0], [-sz, cz, 0, 0], [0, 0, 1, 0], [0, 0, 0, 1]], prm.dtype)
        Z = jnp.diag(jnp.array([zx, zy, zz, 1.0], prm.dtype))
        S = jnp.array([[1, s0, s1, 0], [0, 1, s2, 0], [0, 0, 1, 0], [0, 0, 0, 1]], prm.dtype)
        return T @ Rx @ Ry @ Rz @ Z @ S

    return jax.vmap(one_mat)(prm.T.reshape(batch, 12))


if __name__ == "__main__":
    key = jax.random.PRNGKey(0)
    batch, dim = 4, 3

    # primary: small batch (single full-extent block)
    mat = affine_sample(key, batch=batch, dim=dim)
    mat = jax.block_until_ready(mat)
    assert mat.shape == (batch, dim + 1, dim + 1)
    assert mat.dtype == jnp.float32

    noise = jax.random.normal(key, (12, batch), jnp.float32)
    ref = _affine_sample_ref(_prm_from_noise(noise), dim=dim)
    assert jnp.allclose(mat, ref, atol=1e-5, rtol=1e-5)

    # secondary: multi-block grid with ragged last block (tile=2048, grid=2)
    key2 = jax.random.PRNGKey(1)
    b2 = 2600
    mat2 = jax.block_until_ready(affine_sample(key2, batch=b2, dim=dim))
    noise2 = jax.random.normal(key2, (12, b2), jnp.float32)
    ref2 = _affine_sample_ref(_prm_from_noise(noise2), dim=dim)
    assert mat2.shape == (b2, dim + 1, dim + 1)
    assert jnp.allclose(mat2, ref2, atol=1e-5, rtol=1e-5)

    print("KERNEL_OK")
</pallas_src>

<mosaic_0001>
module attributes {stable_mosaic.version = 11 : i64} {
  func.func @_affine_classic_kernel(%arg0: i32, %arg1: memref<12x4xf32, #tpu.memory_space<vmem>>, %arg2: memref<16x4xf32, #tpu.memory_space<vmem>>) attributes {dimension_semantics = [#tpu.dimension_semantics<parallel>], iteration_bounds = array<i64: 1>, scalar_prefetch = 0 : i64, scratch_operands = 0 : i64, tpu.core_type = #tpu.core_type<tc>, window_params = [{transform_indices = @transform_0, window_bounds = array<i64: 12, 4>}, {transform_indices = @transform_1, window_bounds = array<i64: 16, 4>}]} {
    %c0 = arith.constant 0 : index
    %c0_0 = arith.constant 0 : index
    %0 = vector.load %arg1[%c0, %c0_0] : memref<12x4xf32, #tpu.memory_space<vmem>>, vector<12x4xf32>
    %1 = vector.extract_strided_slice %0 {offsets = [0, 0], sizes = [3, 4], strides = [1, 1]} : vector<12x4xf32> to vector<3x4xf32>
    %cst = arith.constant 5.000000e+00 : f32
    %2 = vector.broadcast %cst : f32 to vector<3x4xf32>
    %3 = arith.mulf %1, %2 : vector<3x4xf32>
    %4 = vector.extract_strided_slice %0 {offsets = [3, 0], sizes = [3, 4], strides = [1, 1]} : vector<12x4xf32> to vector<3x4xf32>
    %cst_1 = arith.constant 0.00174532924 : f32
    %5 = vector.broadcast %cst_1 : f32 to vector<3x4xf32>
    %6 = arith.mulf %4, %5 : vector<3x4xf32>
    %7 = vector.extract_strided_slice %0 {offsets = [6, 0], sizes = [3, 4], strides = [1, 1]} : vector<12x4xf32> to vector<3x4xf32>
    %cst_2 = arith.constant 0.231049061 : f32
    %8 = vector.broadcast %cst_2 : f32 to vector<3x4xf32>
    %9 = arith.mulf %7, %8 : vector<3x4xf32>
    %10 = math.exp %9 : vector<3x4xf32>
    %11 = vector.extract_strided_slice %0 {offsets = [9, 0], sizes = [3, 4], strides = [1, 1]} : vector<12x4xf32> to vector<3x4xf32>
    %cst_3 = arith.constant 0.00999999977 : f32
    %12 = vector.broadcast %cst_3 : f32 to vector<3x4xf32>
    %13 = arith.mulf %11, %12 : vector<3x4xf32>
    %14 = vector.extract_strided_slice %3 {offsets = [0, 0], sizes = [1, 4], strides = [1, 1]} : vector<3x4xf32> to vector<1x4xf32>
    %15 = vector.extract_strided_slice %3 {offsets = [1, 0], sizes = [1, 4], strides = [1, 1]} : vector<3x4xf32> to vector<1x4xf32>
    %16 = vector.extract_strided_slice %3 {offsets = [2, 0], sizes = [1, 4], strides = [1, 1]} : vector<3x4xf32> to vector<1x4xf32>
    %17 = vector.extract_strided_slice %6 {offsets = [0, 0], sizes = [1, 4], strides = [1, 1]} : vector<3x4xf32> to vector<1x4xf32>
    %18 = vector.extract_strided_slice %6 {offsets = [1, 0], sizes = [1, 4], strides = [1, 1]} : vector<3x4xf32> to vector<1x4xf32>
    %19 = vector.extract_strided_slice %6 {offsets = [2, 0], sizes = [1, 4], strides = [1, 1]} : vector<3x4xf32> to vector<1x4xf32>
    %20 = vector.extract_strided_slice %10 {offsets = [0, 0], sizes = [1, 4], strides = [1, 1]} : vector<3x4xf32> to vector<1x4xf32>
    %21 = vector.extract_strided_slice %10 {offsets = [1, 0], sizes = [1, 4], strides = [1, 1]} : vector<3x4xf32> to vector<1x4xf32>
    %22 = vector.extract_strided_slice %10 {offsets = [2, 0], sizes = [1, 4], strides = [1, 1]} : vector<3x4xf32> to vector<1x4xf32>
    %23 = vector.extract_strided_slice %13 {offsets = [0, 0], sizes = [1, 4], strides = [1, 1]} : vector<3x4xf32> to vector<1x4xf32>
    %24 = vector.extract_strided_slice %13 {offsets = [1, 0], sizes = [1, 4], strides = [1, 1]} : vector<3x4xf32> to vector<1x4xf32>
    %25 = vector.extract_strided_slice %13 {offsets = [2, 0], sizes = [1, 4], strides = [1, 1]} : vector<3x4xf32> to vector<1x4xf32>
    %26 = math.cos %17 : vector<1x4xf32>
    %27 = math.sin %17 : vector<1x4xf32>
    %28 = math.cos %18 : vector<1x4xf32>
    %29 = math.sin %18 : vector<1x4xf32>
    %30 = math.cos %19 : vector<1x4xf32>
    %31 = math.sin %19 : vector<1x4xf32>
    %32 = arith.mulf %28, %30 : vector<1x4xf32>
    %33 = arith.mulf %28, %31 : vector<1x4xf32>
    %cst_4 = arith.constant 0.000000e+00 : f32
    %34 = vector.broadcast %cst_4 : f32 to vector<1x4xf32>
    %35 = arith.subf %34, %26 : vector<1x4xf32>
    %36 = arith.mulf %35, %31 : vector<1x4xf32>
    %37 = arith.mulf %27, %29 : vector<1x4xf32>
    %38 = arith.mulf %37, %30 : vector<1x4xf32>
    %39 = arith.subf %36, %38 : vector<1x4xf32>
    %40 = arith.mulf %26, %30 : vector<1x4xf32>
    %41 = arith.mulf %27, %29 : vector<1x4xf32>
    %42 = arith.mulf %41, %31 : vector<1x4xf32>
    %43 = arith.subf %40, %42 : vector<1x4xf32>
    %44 = arith.mulf %27, %28 : vector<1x4xf32>
    %45 = arith.mulf %27, %31 : vector<1x4xf32>
    %46 = arith.mulf %26, %29 : vector<1x4xf32>
    %47 = arith.mulf %46, %30 : vector<1x4xf32>
    %48 = arith.subf %45, %47 : vector<1x4xf32>
    %cst_5 = arith.constant 0.000000e+00 : f32
    %49 = vector.broadcast %cst_5 : f32 to vector<1x4xf32>
    %50 = arith.subf %49, %27 : vector<1x4xf32>
    %51 = arith.mulf %50, %30 : vector<1x4xf32>
    %52 = arith.mulf %26, %29 : vector<1x4xf32>
    %53 = arith.mulf %52, %31 : vector<1x4xf32>
    %54 = arith.subf %51, %53 : vector<1x4xf32>
    %55 = arith.mulf %26, %28 : vector<1x4xf32>
    %56 = arith.mulf %32, %20 : vector<1x4xf32>
    %57 = arith.mulf %39, %20 : vector<1x4xf32>
    %58 = arith.mulf %48, %20 : vector<1x4xf32>
    %59 = arith.mulf %33, %21 : vector<1x4xf32>
    %60 = arith.mulf %43, %21 : vector<1x4xf32>
    %61 = arith.mulf %54, %21 : vector<1x4xf32>
    %62 = arith.mulf %29, %22 : vector<1x4xf32>
    %63 = arith.mulf %44, %22 : vector<1x4xf32>
    %64 = arith.mulf %55, %22 : vector<1x4xf32>
    %65 = arith.mulf %56, %23 : vector<1x4xf32>
    %66 = arith.addf %65, %59 : vector<1x4xf32>
    %67 = arith.mulf %57, %23 : vector<1x4xf32>
    %68 = arith.addf %67, %60 : vector<1x4xf32>
    %69 = arith.mulf %58, %23 : vector<1x4xf32>
    %70 = arith.addf %69, %61 : vector<1x4xf32>
    %71 = arith.mulf %56, %24 : vector<1x4xf32>
    %72 = arith.mulf %59, %25 : vector<1x4xf32>
    %73 = arith.addf %71, %72 : vector<1x4xf32>
    %74 = arith.addf %73, %62 : vector<1x4xf32>
    %75 = arith.mulf %57, %24 : vector<1x4xf32>
    %76 = arith.mulf %60, %25 : vector<1x4xf32>
    %77 = arith.addf %75, %76 : vector<1x4xf32>
    %78 = arith.addf %77, %63 : vector<1x4xf32>
    %79 = arith.mulf %58, %24 : vector<1x4xf32>
    %80 = arith.mulf %61, %25 : vector<1x4xf32>
    %81 = arith.addf %79, %80 : vector<1x4xf32>
    %82 = arith.addf %81, %64 : vector<1x4xf32>
    %cst_6 = arith.constant 0.000000e+00 : f32
    %83 = vector.broadcast %cst_6 : f32 to vector<1x4xf32>
    %cst_7 = arith.constant 1.000000e+00 : f32
    %84 = vector.broadcast %cst_7 : f32 to vector<1x4xf32>
    %85 = tpu.concatenate %56, %66, %74, %14, %57, %68, %78, %15 in 0 : vector<1x4xf32>, vector<1x4xf32>, vector<1x4xf32>, vector<1x4xf32>, vector<1x4xf32>, vector<1x4xf32>, vector<1x4xf32>, vector<1x4xf32> -> vector<8x4xf32>
    %86 = tpu.concatenate %58, %70, %82, %16, %83, %83, %83, %84 in 0 : vector<1x4xf32>, vector<1x4xf32>, vector<1x4xf32>, vector<1x4xf32>, vector<1x4xf32>, vector<1x4xf32>, vector<1x4xf32>, vector<1x4xf32> -> vector<8x4xf32>
    %c0_8 = arith.constant 0 : index
    %c0_9 = arith.constant 0 : index
    %87 = vector.load %arg2[%c0_8, %c0_9] : memref<16x4xf32, #tpu.memory_space<vmem>>, vector<8x4xf32>
    tpu.vector_store %arg2[%c0_8, %c0_9], %85 {strides = array<i32>} : memref<16x4xf32, #tpu.memory_space<vmem>>, vector<8x4xf32>,
    %c8 = arith.constant 8 : index
    %c0_10 = arith.constant 0 : index
    %88 = vector.load %arg2[%c8, %c0_10] : memref<16x4xf32, #tpu.memory_space<vmem>>, vector<8x4xf32>
    tpu.vector_store %arg2[%c8, %c0_10], %86 {strides = array<i32>} : memref<16x4xf32, #tpu.memory_space<vmem>>, vector<8x4xf32>,
    return
  }
  func.func @transform_0(%arg0: i32) -> (i32, i32) {
    %c0_i32 = arith.constant 0 : i32
    %c0_i32_0 = arith.constant 0 : i32
    return %c0_i32, %arg0 : i32, i32
  }
  func.func @transform_1(%arg0: i32) -> (i32, i32) {
    %c0_i32 = arith.constant 0 : i32
    %c0_i32_0 = arith.constant 0 : i32
    return %c0_i32, %arg0 : i32, i32
  }
}

</mosaic_0001>

<bundles_post_ra>
// kernel: tpu_custom_call.1
= control target key start
LH: loop header
LB: loop body
LE: loop exit
PB: predicated region body
PF: predicated region fallthrough
CT: control target
= control target key end

     0   :  { %v481_v13 = vmov 683565275   ;;  %v482_v15 = vmov 2475754826   ;;  %v483_v17 = vmov 2131351028   ;;  %s596_s0 = inlined_call_operand.vmem [shape: f32[12,4], index: 0, kind: input, shape index: {}]   ;;  %s597_s1 = inlined_call_operand.vmem [shape: f32[16,4], index: 1, kind: output, shape index: {}]  }
   0x1   :  { %v501_v0 = vld [vmem:[%s596_s0] sm:$0xff]  ;;  %v484_v19 = vmov 2102212464   ;;  %v485_v21 = vmov 920167782  }
   0x2   :  { %v504_v1 = vmul.f32 0.0017453292, %v501_v0  ;;  %v486_v27 = vmov 1326507024  }
   0x4   :  { %v22_v2 = vand.u32 2139095040, %v504_v1  ;;  %v19_v4 = vand.u32 2147483647, %v504_v1  ;;  %vm21_vm12 = vcmp.lt.s32.totalorder %v504_v1, 0 }
   0x6   :  { %v23_v3 = vshrl.u32 %v22_v2, 23  ;;  %v26_v7 = vand.u32 8388607, %v19_v4  ;;  %vm20_vm13 = vcmp.le.f32.partialorder %v19_v4, 0.7853982 }
   0x8   :  { %v464_v5 = vadd.s32 4294967169, %v23_v3  ;;  %v27_v10 = vor.u32 8388608, %v26_v7  ;;  %v487_v3 = vmov 0  }
   0xa   :  { %v29_v6 = vadd.s32 1, %v464_v5  ;;  %v513_v29 = vshll.u32 %v27_v10, 8 }
   0xc   :  { %vm30_vm0 = vcmp.gt.s32.totalorder %v29_v6, 0  ;;  %v68_v41 = vand.u32 65535, %v513_v29  ;;  %v69_v42 = vshrl.u32 %v513_v29, 16 }
   0xd   :  { %v31_v8 = vsel %vm30_vm0, %v29_v6, 0 }
   0xe   :  { %v33_v9 = vand.u32 31, %v31_v8  ;;  %v510_v11 = vshrl.u32 %v31_v8, 5 }
  0x10   :  { %v34_v12 = vsub.s32 32, %v33_v9  ;;  %v36_v14 = vshll.u32 %v481_v13, %v33_v9  ;;  %v39_v16 = vshll.u32 %v482_v15, %v33_v9  ;;  %v42_v18 = vshll.u32 %v483_v17, %v33_v9 }
  0x11   :  { %v45_v20 = vshll.u32 %v484_v19, %v33_v9  ;;  %v48_v22 = vshll.u32 %v485_v21, %v33_v9  ;;  %vm51_vm1 = vcmp.lt.s32.totalorder %v510_v11, 1  ;;  %vm54_vm2 = vcmp.lt.s32.totalorder %v510_v11, 4 }
  0x12   :  { %v37_v23 = vshrl.u32 %v482_v15, %v34_v12  ;;  %v40_v24 = vshrl.u32 %v483_v17, %v34_v12  ;;  %v43_v25 = vshrl.u32 %v484_v19, %v34_v12  ;;  %v46_v26 = vshrl.u32 %v485_v21, %v34_v12 }
  0x13   :  { %v49_v28 = vshrl.u32 %v486_v27, %v34_v12  ;;  %vm53_vm3 = vcmp.lt.s32.totalorder %v510_v11, 3  ;;  %vm52_vm4 = vcmp.lt.s32.totalorder %v510_v11, 2  ;;  %v35_v49 = vshrl.u32 %v481_v13, %v34_v12 }
  0x14   :  { %v38_v30 = vor.u32 %v37_v23, %v36_v14  ;;  %v41_v31 = vor.u32 %v40_v24, %v39_v16  ;;  %v44_v32 = vor.u32 %v43_v25, %v42_v18  ;;  %v47_v33 = vor.u32 %v46_v26, %v45_v20 }
  0x15   :  { %v50_v34 = vor.u32 %v49_v28, %v48_v22 }
  0x16   :  { %v59_v35 = vsel %vm51_vm1, %v38_v30, %v41_v31  ;;  %v63_v36 = vsel %vm51_vm1, %v41_v31, %v44_v32  ;;  %v60_v37 = vsel %vm54_vm2, %v47_v33, 920167782  ;;  %v55_v62 = vsel %vm51_vm1, %v35_v49, %v38_v30 }
  0x17   :  { %v64_v38 = vsel %vm54_vm2, %v50_v34, 1326507024  ;;  %v61_v39 = vsel %vm53_vm3, %v44_v32, %v60_v37  ;;  %v56_v2 = vsel %vm54_vm2, %v44_v32, 2102212464 }
  0x18   :  { %v65_v40 = vsel %vm53_vm3, %v47_v33, %v64_v38  ;;  %v62_v43 = vsel %vm52_vm4, %v59_v35, %v61_v39  ;;  %v57_v14 = vsel %vm53_vm3, %v41_v31, %v56_v2 }
  0x19   :  { %v66_v44 = vsel %vm52_vm4, %v63_v36, %v65_v40  ;;  %v92_v47 = vand.u32 65535, %v62_v43  ;;  %v93_v48 = vshrl.u32 %v62_v43, 16  ;;  %v58_v22 = vsel %vm52_vm4, %v55_v62, %v57_v14 }
  0x1a   :  { %v70_v45 = vand.u32 65535, %v66_v44  ;;  %v71_v46 = vshrl.u32 %v66_v44, 16  ;;  %v112_v26 = vmul.u32 %v513_v29, %v58_v22  ;;  %vm162_vm4 = vweird.f32 %v504_v1 }
  0x1b   :  { %v94_v53 = vmul.u32 %v92_v47, %v68_v41  ;;  %v95_v54 = vmul.u32 %v93_v48, %v68_v41  ;;  %v96_v55 = vmul.u32 %v92_v47, %v69_v42  ;;  %v97_v59 = vmul.u32 %v93_v48, %v69_v42 }
  0x1c   :  { %v72_v50 = vmul.u32 %v70_v45, %v68_v41  ;;  %v73_v51 = vmul.u32 %v71_v46, %v68_v41  ;;  %v74_v52 = vmul.u32 %v70_v45, %v69_v42  ;;  %v75_v56 = vmul.u32 %v71_v46, %v69_v42 }
  0x1d   :  { %v98_v60 = vshll.u32 %v95_v54, 16  ;;  %v100_v61 = vshll.u32 %v96_v55, 16  ;;  %v99_v12 = vshrl.u32 %v95_v54, 16  ;;  %v101_v18 = vshrl.u32 %v96_v55, 16 }
  0x1e   :  { %v76_v57 = vshll.u32 %v73_v51, 16  ;;  %v78_v58 = vshll.u32 %v74_v52, 16  ;;  %v77_v7 = vshrl.u32 %v73_v51, 16  ;;  %v79_v15 = vshrl.u32 %v74_v52, 16  ;;  %v9_v52 = vld [vmem:[%s596_s0 + $0x8] sm:$0xf] }
  0x1f   :  { %vm102_vm6 = vc.u32 %v94_v53, %v98_v60  ;;  %v104_v6 = vadd.s32 %v98_v60, %v94_v53 }
  0x20   :  { %vm80_vm5 = vc.u32 %v72_v50, %v76_v57  ;;  %v82_v63 = vadd.s32 %v76_v57, %v72_v50  ;;  %v103_v9 = vsel %vm102_vm6, 1, %v487_v3  ;;  %vm427_vm6 = vcmask 1041408  }
  0x21   :  { %v81_v5 = vsel %vm80_vm5, 1, %v487_v3  ;;  %v105_v13 = vadd.s32 %v103_v9, %v97_v59  ;;  %vm106_vm8 = vc.u32 %v104_v6, %v100_v61  ;;  %v108_v21 = vadd.s32 %v104_v6, %v100_v61 }
  0x22   :  { %v83_v8 = vadd.s32 %v81_v5, %v75_v56  ;;  %vm84_vm7 = vc.u32 %v82_v63, %v78_v58  ;;  %v107_v17 = vsel %vm106_vm8, 1, %v487_v3  ;;  %v12_v56 = vmul.f32 0.23104906, %v501_v0 }
  0x23   :  { %v85_v10 = vsel %vm84_vm7, 1, %v487_v3  ;;  %v109_v19 = vadd.s32 %v107_v17, %v105_v13  ;;  %v13_v58 = vmul.f32 0.23104906, %v9_v52  ;;  %vm425_vm5 = vcmask 1040384  }
  0x24   :  { %v87_v16 = vadd.s32 %v85_v10, %v83_v8  ;;  %v14_v62 = vmul.f32 1.442695, %v12_v56  ;;  %vm429_vm7 = vcmask 1042432   ;;  %vm431_vm8 = vcmask 1043456  }
  0x25   :  { %v110_v23 = vadd.s32 %v109_v19, %v99_v12  ;;  %v16_v4 = vmul.f32 1.442695, %v13_v58 }
  0x26   :  { %v88_v20 = vadd.s32 %v87_v16, %v77_v7  ;;  %477 = vpow2.f32 %v14_v62 }
  0x27   :  { %v111_v25 = vadd.s32 %v110_v23, %v101_v18  ;;  %479 = vpow2.f32 %v16_v4 }
  0x28   :  { %v89_v24 = vadd.s32 %v88_v20, %v79_v15  ;;  %v557_v20 = vmul.f32 0.01, %v9_v52 }
  0x29   :  { %v115_v27 = vadd.s32 1, %v111_v25 }
  0x2a   :  { %vm114_vm9 = vc.u32 %v89_v24, %v108_v21  ;;  %v113_v11 = vadd.s32 %v108_v21, %v89_v24  ;;  %v560_v24 = vmul.f32 5.0, %v501_v0 }
  0x2b   :  { %v116_v28 = vsel %vm114_vm9, %v115_v27, %v111_v25  ;;  %vm433_vm9 = vcmask 1044480  }
  0x2c   :  { %v117_v30 = vadd.s32 %v116_v28, %v112_v26  ;;  %v553_v16 = vpop.eup %477 }
  0x2d   :  { %v555_v19 = vpop.eup %479  ;;  %v357_v25 = vrot.slane %v553_v16, 2  ;;  %v360_v26 = vrot.slane %v553_v16, 3 }
  0x2e   :  { %v118_v31 = vadd.s32 536870912, %v117_v30 }
  0x30   :  { %v119_v32 = vshrl.u32 %v118_v31, 30  ;;  %v370_v31 = vrot.slane %v555_v19, 4 }
  0x32   :  { %v120_v33 = vshll.u32 %v119_v32, 30  ;;  %v143_v50 = vsub.s32 4, %v119_v32 }
  0x34   :  { %v121_v34 = vsub.s32 %v117_v30, %v120_v33  ;;  %v144_v54 = vsel %vm21_vm12, %v143_v50, %v119_v32  ;;  %v365_v30 = vrot.slane %v553_v16, 4 }
  0x35   :  { %v146_v59 = vsel %vm20_vm13, 0, %v144_v54 }
  0x36   :  { %vm122_vm10 = vcmp.lt.s32.totalorder %v121_v34, 0  ;;  %v123_v35 = vsub.s32 0, %v121_v34  ;;  %v317_v3 = vadd.s32 3, %v146_v59  ;;  %v163_v9 = vand.u32 3, %v146_v59 }
  0x38   :  { %v124_v36 = vsel %vm122_vm10, %v123_v35, %v121_v34  ;;  %v318_v10 = vand.u32 3, %v317_v3  ;;  %vm168_vm14 = vcmp.eq.s32.totalorder %v163_v9, 2  ;;  %vm164_vm0 = vcmp.lt.s32.totalorder %v163_v9, 2 }
  0x39   :  { %v125_v37 = vclz %v124_v36  ;;  %vm165_vm1 = vcmp.eq.s32.totalorder %v163_v9, 0  ;;  %v378_v35 = vrot.slane %v557_v20, 5  ;;  %vm435_vm10 = vcmask 1045504  }
  0x3a   :  { %vm323_vm15 = vcmp.eq.s32.totalorder %v318_v10, 2  ;;  %vm320_vm2 = vcmp.eq.s32.totalorder %v318_v10, 0  ;;  %vm319_vm3 = vcmp.lt.s32.totalorder %v318_v10, 2 }
  0x3b   :  { %v465_v38 = vadd.s32 4294967294, %v125_v37  ;;  %v389_v37 = vrot.slane %v557_v20, 7 }
  0x3d   :  { %vm466_vm11 = vcmp.lt.s32.totalorder %v465_v38, 0 }
  0x3e   :  { %v128_v39 = vsel %vm466_vm11, 0, %v465_v38  ;;  %vm437_vm11 = vcmask 1046528  }
  0x3f   :  { %v129_v40 = vsub.s32 32, %v128_v39  ;;  %v130_v41 = vshll.u32 %v121_v34, %v128_v39  ;;  %v133_v42 = vsub.s32 4294967266, %v128_v39  ;;  %v373_v34 = vrot.slane %v555_v19, 5 }
  0x41   :  { %v131_v29 = vshrl.u32 %v113_v11, %v129_v40  ;;  %v134_v43 = vadd.s32 127, %v133_v42 }
  0x43   :  { %v132_v44 = vor.u32 %v131_v29, %v130_v41  ;;  %v135_v45 = vshll.u32 %v134_v43, 23  ;;  %v412_v29 = vrot.slane %v560_v24, 5  ;;  %v423_v43 = vrot.slane %v560_v24, 2 }
  0x45   :  { %v136_v46 = vor.u32 4788187, %v135_v45  ;;  %v139_v47 = vcvt.s32.f32 %v132_v44 }
  0x47   :  { %v137_v48 = vand.u32 2147483647, %v136_v46 }
  0x49   :  { %v140_v49 = vmul.f32 %v139_v47, %v137_v48 }
  0x4b   :  { %v141_v51 = vxor.u32 2147483648, %v140_v49 }
  0x4d   :  { %v142_v53 = vsel %vm21_vm12, %v141_v51, %v140_v49  ;;  %vm457_vm12 = vcmask 31744  }
  0x4e   :  { %v145_v55 = vsel %vm20_vm13, %v504_v1, %v142_v53  ;;  %v382_v1 = vrot.slane %v557_v20, 6 }
  0x4f   :  { %v147_v57 = vmul.f32 %v145_v55, %v145_v55 }
  0x51   :  { %v148_v60 = vmul.f32 -0.001358992, %v147_v57  ;;  %v155_v61 = vmul.f32 -0.00019511016, %v147_v57 }
  0x53   :  { %v149_v63 = vadd.f32 0.041655596, %v148_v60  ;;  %v156_v2 = vadd.f32 0.008332121, %v155_v61 }
  0x55   :  { %v150_v5 = vmul.f32 %v149_v63, %v147_v57  ;;  %v157_v6 = vmul.f32 %v156_v2, %v147_v57 }
  0x57   :  { %v151_v7 = vadd.f32 -0.4999988, %v150_v5  ;;  %v158_v8 = vadd.f32 -0.16666654, %v157_v6 }
  0x59   :  { %v152_v12 = vmul.f32 %v151_v7, %v147_v57  ;;  %v159_v13 = vmul.f32 %v158_v8, %v147_v57 }
  0x5b   :  { %v153_v14 = vadd.f32 1.0, %v152_v12  ;;  %v160_v15 = vadd.f32 1.0, %v159_v13 }
  0x5d   :  { %v161_v17 = vmul.f32 %v160_v15, %v145_v55  ;;  %v169_v18 = vxor.u32 2147483648, %v153_v14 }
  0x5f   :  { %v166_v21 = vxor.u32 2147483648, %v161_v17  ;;  %v170_v22 = vsel %vm168_vm14, %v169_v18, %v161_v17  ;;  %v325_v23 = vsel %vm323_vm15, %v169_v18, %v161_v17 }
  0x61   :  { %v167_v27 = vsel %vm165_vm1, %v153_v14, %v166_v21  ;;  %v322_v28 = vsel %vm320_vm2, %v153_v14, %v166_v21 }
  0x62   :  { %v171_v32 = vsel %vm164_vm0, %v167_v27, %v170_v22  ;;  %v326_v33 = vsel %vm319_vm3, %v322_v28, %v325_v23 }
  0x63   :  { %v172_v0 = vsel %vm162_vm4, nan, %v171_v32  ;;  %v327_v36 = vsel %vm162_vm4, nan, %v326_v33 }
  0x64   :  { %v329_v38 = vrot.slane %v172_v0, 1  ;;  %v333_v11 = vrot.slane %v327_v36, 1  ;;  %v336_v39 = vsub.f32 0.0, %v172_v0  ;;  %v337_v40 = vrot.slane %v327_v36, 2 }
  0x65   :  { %v341_v41 = vrot.slane %v172_v0, 2  ;;  %v352_v42 = vsub.f32 0.0, %v327_v36  ;;  %v372_v58 = vmul.f32 %v370_v31, %v327_v36 }
  0x66   :  { %v331_v44 = vmul.f32 %v329_v38, %v172_v0  ;;  %v335_v45 = vmul.f32 %v333_v11, %v172_v0  ;;  %v339_v46 = vmul.f32 %v337_v40, %v336_v39  ;;  %v340_v47 = vmul.f32 %v333_v11, %v327_v36 }
  0x67   :  { %v345_v48 = vmul.f32 %v341_v41, %v172_v0  ;;  %v348_v49 = vmul.f32 %v329_v38, %v327_v36  ;;  %v349_v50 = vmul.f32 %v337_v40, %v327_v36  ;;  %v353_v51 = vmul.f32 %v352_v42, %v341_v41 }
  0x68   :  { %v343_v52 = vmul.f32 %v341_v41, %v340_v47  ;;  %v346_v53 = vmul.f32 %v340_v47, %v337_v40  ;;  %v350_v54 = vmul.f32 %v341_v41, %v335_v45  ;;  %v354_v55 = vmul.f32 %v337_v40, %v335_v45 }
  0x69   :  { %v359_v56 = vmul.f32 %v357_v25, %v331_v44  ;;  %v364_v57 = vmul.f32 %v360_v26, %v335_v45  ;;  %v375_v63 = vmul.f32 %v373_v34, %v348_v49  ;;  %v376_v9 = vmul.f32 %v373_v34, %v331_v44 }
  0x6a   :  { %v344_v59 = vsub.f32 %v339_v46, %v343_v52  ;;  %v347_v60 = vsub.f32 %v345_v48, %v346_v53  ;;  %v351_v61 = vsub.f32 %v349_v50, %v350_v54  ;;  %v355_v62 = vsub.f32 %v353_v51, %v354_v55 }
  0x6b   :  { %v380_v2 = vmul.f32 %v378_v35, %v359_v56  ;;  %v388_v4 = vmul.f32 %v382_v1, %v359_v56  ;;  %v391_v3 = vmul.f32 %v389_v37, %v364_v57  ;;  %v403_v13 = vrot.slane %v359_v56, 4 }
  0x6c   :  { %v362_v5 = vmul.f32 %v360_v26, %v344_v59  ;;  %v363_v6 = vmul.f32 %v360_v26, %v351_v61  ;;  %v367_v7 = vmul.f32 %v365_v30, %v347_v60  ;;  %v368_v8 = vmul.f32 %v365_v30, %v355_v62 }
  0x6d   :  { %v381_v10 = vadd.f32 %v380_v2, %v364_v57  ;;  %v392_v12 = vadd.f32 %v391_v3, %v388_v4 }
  0x6e   :  { %v384_v14 = vmul.f32 %v382_v1, %v362_v5  ;;  %v386_v15 = vmul.f32 %v382_v1, %v363_v6  ;;  %v394_v16 = vmul.f32 %v389_v37, %v362_v5  ;;  %v395_v17 = vmul.f32 %v367_v7, %v557_v20 }
  0x6f   :  { %v393_v18 = vadd.f32 %v392_v12, %v372_v58  ;;  %v398_v19 = vmul.f32 %v389_v37, %v363_v6  ;;  %v399_v21 = vmul.f32 %v368_v8, %v557_v20  ;;  %v406_v22 = vrot.slane %v381_v10, 3 }
  0x70   :  { %v385_v23 = vadd.f32 %v384_v14, %v367_v7  ;;  %v387_v25 = vadd.f32 %v386_v15, %v368_v8  ;;  %v396_v27 = vadd.f32 %v395_v17, %v394_v16  ;;  %v415_v26 = vrot.slane %v362_v5, 7 }
  0x71   :  { %v400_v28 = vadd.f32 %v399_v21, %v398_v19  ;;  %v409_v30 = vrot.slane %v393_v18, 2  ;;  %v426_v31 = vsel %vm425_vm5, %v403_v13, %v406_v22  ;;  %v440_v32 = vrot.slane %v363_v6, 3 }
  0x72   :  { %v397_v33 = vadd.f32 %v396_v27, %v375_v63  ;;  %v418_v34 = vrot.slane %v385_v23, 6  ;;  %v443_v35 = vrot.slane %v387_v25, 2  ;;  %v448_v37 = vrot.slane %v560_v24, 7 }
  0x73   :  { %v401_v0 = vadd.f32 %v400_v28, %v376_v9  ;;  %v428_v36 = vsel %vm427_vm6, %v426_v31, %v409_v30 }
  0x74   :  { %v421_v20 = vrot.slane %v397_v33, 5  ;;  %v430_v1 = vsel %vm429_vm7, %v428_v36, %v412_v29  ;;  %v450_v38 = vsel %vm425_vm5, %v440_v32, %v443_v35 }
  0x75   :  { %v432_v11 = vsel %vm431_vm8, %v430_v1, %v415_v26  ;;  %v446_v39 = vrot.slane %v401_v0, 1 }
  0x76   :  { %v434_v40 = vsel %vm433_vm9, %v432_v11, %v418_v34 }
  0x77   :  { %v436_v41 = vsel %vm435_vm10, %v434_v40, %v421_v20  ;;  %v451_v42 = vsel %vm427_vm6, %v450_v38, %v446_v39 }
  0x78   :  { %v438_v44 = vsel %vm437_vm11, %v436_v41, %v423_v43  ;;  %v452_v29 = vsel %vm429_vm7, %v451_v42, %v448_v37 }
  0x79   :  { %v453_v45 = vsel %vm431_vm8, %v452_v29, 0.0  ;;  %458 = vst.msk [vmem:[%s597_s1] sm:$0xff] %vm457_vm12, %v438_v44 }
  0x7a   :  { %v454_v46 = vsel %vm433_vm9, %v453_v45, 0.0 }
  0x7b   :  { %v455_v47 = vsel %vm435_vm10, %v454_v46, 0.0 }
  0x7c   :  { %v456_v48 = vsel %vm437_vm11, %v455_v47, 1.0 }
  0x7d   :  { %459 = vst.msk [vmem:[%s597_s1 + $0x8] sm:$0xff] %vm457_vm12, %v456_v48 }

</bundles_post_ra>
